<compile_context>
chip_gen: v5e
topology: v5e:2x2
jax: 0.10.0
libtpu: 0.0.40
codegen_flags: <defaults>
</compile_context>

<pallas_src>
import functools

import jax
import jax.numpy as jnp
from jax.experimental import pallas as pl
from jax.experimental.pallas import tpu as pltpu


def _round_up(x, m):
    return ((x + m - 1) // m) * m


def _vmem_capacity_bytes():
    try:
        cap = int(pltpu.get_tpu_info().vmem_capacity_bytes)
        if cap > 0:
            return cap
    except Exception:
        pass
    return 64 * 1024 * 1024  # conservative fallback (v7x-sized VMEM)


_VMEM_CAP = _vmem_capacity_bytes()
if _VMEM_CAP >= 96 * 1024 * 1024:          # v5e / v6e: 128 MiB physical VMEM
    _VMEM_LIMIT_BYTES = 100 * 1024 * 1024
else:                                       # v7x (64 MiB) or unknown
    _VMEM_LIMIT_BYTES = 52 * 1024 * 1024

_MAX_TB_FUSED = 256
_MAX_TB_TILED = 512
_FUSED_SLACK_BYTES = 8 * 1024 * 1024        # headroom for compiler scratch


def _fused_vmem_footprint(Fp, tb):
    """Worst-case VMEM bytes of the fused (resident-Wt) kernel."""
    wt = 2 * Fp * Fp * 2          # bf16 Wt, assume double-buffered (worst case)
    xin = 2 * tb * Fp * 2         # bf16 X tile, double-buffered
    xout = 2 * tb * Fp * 4        # f32 out tile, double-buffered
    live = 16 * tb * Fp           # f32 carry + f32 matmul result + bf16 cast + mask
    misc = 4 * 4 * Fp + (1 << 20)
    return wt + xin + xout + live + misc


# ----------------------------------------------------------------------------
# Fused kernel: all num_iterations of  relu_blocks( X @ Wt + b )  on one batch
# tile; Wt / bias / mask have constant index maps so they are DMA'd once and
# stay resident in VMEM across the batch grid.
# ----------------------------------------------------------------------------
def _fused_kernel(x_ref, wt_ref, b_ref, m_ref, o_ref, *, num_iterations):
    bias = b_ref[...]                                                   # (1, Fp) f32
    # Hoist the mask broadcast out of the iteration loop (loop-invariant).
    relu_mask = jnp.broadcast_to(m_ref[...], o_ref.shape) > 0.0         # (tb, Fp) bool
    x0 = x_ref[...].astype(jnp.float32)                                 # f32 carry

    def body(_, x):
        y = jnp.dot(x.astype(jnp.bfloat16), wt_ref[...],
                    preferred_element_type=jnp.float32)
        y = y + bias
        return jnp.where(relu_mask, jnp.maximum(y, 0.0), y)

    if num_iterations <= 1:
        x = body(0, x0)
    else:
        x = jax.lax.fori_loop(0, num_iterations, body, x0, unroll=False)
    o_ref[...] = x


def _fused_forward(X, Wt, b, m, *, num_iterations, tb):
    Bp, Fp = X.shape
    kern = functools.partial(_fused_kernel, num_iterations=num_iterations)
    return pl.pallas_call(
        kern,
        out_shape=jax.ShapeDtypeStruct((Bp, Fp), jnp.float32),
        grid_spec=pltpu.PrefetchScalarGridSpec(
            num_scalar_prefetch=0,
            grid=(Bp // tb,),
            in_specs=[
                pl.BlockSpec((tb, Fp), lambda i: (i, 0)),     # X batch tile (bf16)
                pl.BlockSpec((Fp, Fp), lambda i: (0, 0)),     # Wt, resident
                pl.BlockSpec((1, Fp), lambda i: (0, 0)),      # bias, resident
                pl.BlockSpec((1, Fp), lambda i: (0, 0)),      # act mask, resident
            ],
            out_specs=pl.BlockSpec((tb, Fp), lambda i: (i, 0)),
        ),
        compiler_params=pltpu.CompilerParams(
            dimension_semantics=("parallel",),
            vmem_limit_bytes=_VMEM_LIMIT_BYTES,
        ),
    )(X, Wt, b, m)


# ----------------------------------------------------------------------------
# Tiled fallback (large `total`): one iteration of  relu_blocks( X @ Wt + b ).
# f32 accumulation in a VMEM scratch; output dtype is bf16 for intermediate
# iterations and f32 for the final one.
# ----------------------------------------------------------------------------
def _tiled_iter_kernel(x_ref, wt_ref, b_ref, m_ref, o_ref, acc_ref):
    k = pl.program_id(2)

    @pl.when(k == 0)
    def _():
        acc_ref[...] = jnp.zeros_like(acc_ref)

    acc_ref[...] += jnp.dot(x_ref[...], wt_ref[...],
                            preferred_element_type=jnp.float32)

    @pl.when(k == pl.num_programs(2) - 1)
    def _():
        y = acc_ref[...] + b_ref[...]                       # (tb, tf) + (1, tf)
        y = jnp.where(m_ref[...] > 0.0, jnp.maximum(y, 0.0), y)
        o_ref[...] = y.astype(o_ref.dtype)


def _tiled_iteration(X, Wt, b, m, *, tb, tf, tk, out_dtype):
    Bp, Fp = X.shape
    grid = (Bp // tb, Fp // tf, Fp // tk)
    return pl.pallas_call(
        _tiled_iter_kernel,
        out_shape=jax.ShapeDtypeStruct((Bp, Fp), out_dtype),
        grid_spec=pltpu.PrefetchScalarGridSpec(
            num_scalar_prefetch=0,
            grid=grid,
            in_specs=[
                pl.BlockSpec((tb, tk), lambda i, j, k: (i, k)),   # X tile (bf16)
                pl.BlockSpec((tk, tf), lambda i, j, k: (k, j)),   # Wt tile (bf16)
                pl.BlockSpec((1, tf), lambda i, j, k: (0, j)),    # bias tile
                pl.BlockSpec((1, tf), lambda i, j, k: (0, j)),    # act mask tile
            ],
            out_specs=pl.BlockSpec((tb, tf), lambda i, j, k: (i, j)),
            scratch_shapes=[pltpu.VMEM((tb, tf), jnp.float32)],
        ),
        compiler_params=pltpu.CompilerParams(
            dimension_semantics=("parallel", "parallel", "arbitrary"),
            vmem_limit_bytes=_VMEM_LIMIT_BYTES,
        ),
    )(X, Wt, b, m)


# ----------------------------------------------------------------------------
# Module-equivalent wrapper
# ----------------------------------------------------------------------------
class LinearIterativeSequential2DPallas:
    """Pallas/JAX equivalent of LinearIterativeSequential2D (relu / identity acts)."""

    def __init__(self, sizes, use_relu_per_block=None, bias=True,
                 num_iterations=1, densities=1.0, key=None, force_tiled=False):
        self.sizes = tuple(int(s) for s in sizes)
        self.total = sum(self.sizes)
        self.num_iterations = int(num_iterations)

        if use_relu_per_block is None:
            use_relu_per_block = [True] * len(self.sizes)   # activations=F.relu default

        if key is None:
            key = jax.random.PRNGKey(0)
        kw, kb, km = jax.random.split(key, 3)

        # nn.Linear-style init: U(-1/sqrt(in), 1/sqrt(in))
        bound = 1.0 / jnp.sqrt(jnp.float32(self.total))
        W = jax.random.uniform(kw, (self.total, self.total), jnp.float32,
                               -bound, bound)                 # (out, in)
        if densities < 1.0:
            dm = (jax.random.uniform(km, W.shape) < densities).astype(W.dtype)
            W = W * dm
        Wt = jnp.asarray(W.T).astype(jnp.bfloat16)            # (in, out), MXU-native
        if bias:
            b = jax.random.uniform(kb, (1, self.total), jnp.float32, -bound, bound)
        else:
            b = jnp.zeros((1, self.total), jnp.float32)

        mask_parts = [jnp.full((s,), 1.0 if r else 0.0, jnp.float32)
                      for s, r in zip(self.sizes, use_relu_per_block)]
        mask = jnp.concatenate(mask_parts).reshape(1, self.total)

        # Unpadded copies (used by the pure-JAX reference).
        self.Wt_ref, self.b_ref, self.m_ref = Wt, b, mask

        # Lane-dense padded parameters (feature dim -> multiple of 128).
        self.Fp = _round_up(self.total, 128)
        padf = self.Fp - self.total
        self.Wt_p = jnp.pad(Wt, ((0, padf), (0, padf)))
        self.b_p = jnp.pad(b, ((0, 0), (0, padf)))
        self.m_p = jnp.pad(mask, ((0, 0), (0, padf)))

        # Tiled-fallback tile sizes (Fp is always a multiple of 128).
        self.tile_f = next(t for t in (512, 256, 128) if self.Fp % t == 0)
        self.tile_k = next(t for t in (1024, 512, 256, 128) if self.Fp % t == 0)

        self.use_fused = (not force_tiled) and (
            _fused_vmem_footprint(self.Fp, _MAX_TB_FUSED)
            <= _VMEM_LIMIT_BYTES - _FUSED_SLACK_BYTES)

    @functools.partial(jax.jit, static_argnums=0)
    def __call__(self, X):
        if self.num_iterations <= 0:
            return X.astype(jnp.float32)

        B, Fin = X.shape
        # Feed the kernels bf16 (MXU operand dtype) -> half the X DMA bytes.
        X = X.astype(jnp.bfloat16)
        # "Will pad input with 0's if necessary" (also pads to lane-dense Fp).
        if Fin < self.Fp:
            X = jnp.pad(X, ((0, 0), (0, self.Fp - Fin)))

        # Batch tile: minimize zero-row padding; ensure >=2 grid steps in the
        # fused path when B >= 256 so both v7x TensorCores get work.
        max_tb = _MAX_TB_FUSED if self.use_fused else _MAX_TB_TILED
        min_tiles = 2 if (self.use_fused and B >= 256) else 1
        n_tiles = max(min_tiles, -(-B // max_tb))
        tb = _round_up(-(-B // n_tiles), 8)
        Bp = _round_up(B, tb)
        if Bp > B:
            X = jnp.pad(X, ((0, Bp - B), (0, 0)))

        if self.use_fused:
            Y = _fused_forward(X, self.Wt_p, self.b_p, self.m_p,
                               num_iterations=self.num_iterations, tb=tb)
        else:
            for it in range(self.num_iterations):
                last = it == self.num_iterations - 1
                X = _tiled_iteration(
                    X, self.Wt_p, self.b_p, self.m_p,
                    tb=tb, tf=self.tile_f, tk=self.tile_k,
                    out_dtype=jnp.float32 if last else jnp.bfloat16)
            Y = X
        return Y[:B, :self.total]


# ----------------------------------------------------------------------------
# Pure-JAX reference (same bf16-operand / f32-accumulate numerics)
# ----------------------------------------------------------------------------
def _reference(model, X):
    X = X.astype(jnp.float32)
    B, Fin = X.shape
    if Fin < model.total:
        X = jnp.pad(X, ((0, 0), (0, model.total - Fin)))
    for _ in range(model.num_iterations):
        X = jnp.dot(X.astype(jnp.bfloat16), model.Wt_ref,
                    preferred_element_type=jnp.float32)
        X = X + model.b_ref
        X = jnp.where(model.m_ref > 0.0, jnp.maximum(X, 0.0), X)
    return X


if __name__ == "__main__":
    key = jax.random.PRNGKey(0)
    k_param, k_x = jax.random.split(key)

    sizes = (128, 64, 48)          # total = 240 (exercises feature padding to 256)
    batch = 16
    num_iterations = 3
    use_relu = [True, False, True]  # block 1 has identity activation

    model = LinearIterativeSequential2DPallas(
        sizes,
        use_relu_per_block=use_relu,
        bias=True,
        num_iterations=num_iterations,
        densities=1.0,
        key=k_param,
    )
    X = jax.random.normal(k_x, (batch, sum(sizes)), jnp.float32)

    y = jax.block_until_ready(model(X))
    y_ref = _reference(model, X)
    assert y.shape == (batch, sum(sizes))
    assert jnp.allclose(y, y_ref, atol=1e-2, rtol=1e-2), "fused path mismatch vs reference"

    # Also exercise the tiled fallback path (same parameters via same key).
    model_tiled = LinearIterativeSequential2DPallas(
        sizes,
        use_relu_per_block=use_relu,
        bias=True,
        num_iterations=num_iterations,
        densities=1.0,
        key=k_param,
        force_tiled=True,
    )
    y_t = jax.block_until_ready(model_tiled(X))
    assert jnp.allclose(y_t, y_ref, atol=1e-2, rtol=1e-2), "tiled path mismatch vs reference"

    print("KERNEL_OK")
</pallas_src>

<mosaic_0001>
module attributes {stable_mosaic.version = 11 : i64} {
  func.func @_fused_kernel(%arg0: i32, %arg1: memref<16x256xbf16, #tpu.memory_space<vmem>>, %arg2: memref<256x256xbf16, #tpu.memory_space<vmem>>, %arg3: memref<1x256xf32, #tpu.memory_space<vmem>>, %arg4: memref<1x256xf32, #tpu.memory_space<vmem>>, %arg5: memref<16x256xf32, #tpu.memory_space<vmem>>) attributes {dimension_semantics = [#tpu.dimension_semantics<parallel>], iteration_bounds = array<i64: 1>, scalar_prefetch = 0 : i64, scratch_operands = 0 : i64, tpu.core_type = #tpu.core_type<tc>, window_params = [{transform_indices = @transform_0, window_bounds = array<i64: 16, 256>}, {pipeline_mode = #tpu.pipeline_mode<synchronous>, transform_indices = @transform_1, window_bounds = array<i64: 256, 256>}, {pipeline_mode = #tpu.pipeline_mode<synchronous>, transform_indices = @transform_2, window_bounds = array<i64: 1, 256>}, {pipeline_mode = #tpu.pipeline_mode<synchronous>, transform_indices = @transform_3, window_bounds = array<i64: 1, 256>}, {transform_indices = @transform_4, window_bounds = array<i64: 16, 256>}]} {
    %c0 = arith.constant 0 : index
    %c0_0 = arith.constant 0 : index
    %0 = vector.load %arg3[%c0, %c0_0] : memref<1x256xf32, #tpu.memory_space<vmem>>, vector<1x256xf32>
    %c0_1 = arith.constant 0 : index
    %c0_2 = arith.constant 0 : index
    %1 = vector.load %arg4[%c0_1, %c0_2] : memref<1x256xf32, #tpu.memory_space<vmem>>, vector<1x256xf32>
    %2 = vector.shape_cast %1 : vector<1x256xf32> to vector<1x256xf32>
    %3 = vector.broadcast %2 : vector<1x256xf32> to vector<16x256xf32>
    %cst = arith.constant 0.000000e+00 : f32
    %4 = vector.broadcast %cst : f32 to vector<16x256xf32>
    %5 = arith.cmpf ogt, %3, %4 : vector<16x256xf32>
    %c0_3 = arith.constant 0 : index
    %c0_4 = arith.constant 0 : index
    %6 = vector.load %arg1[%c0_3, %c0_4] : memref<16x256xbf16, #tpu.memory_space<vmem>>, vector<16x256xbf16>
    %7 = arith.extf %6 : vector<16x256xbf16> to vector<16x256xf32>
    %c0_i32 = arith.constant 0 : i32
    %c3_i32 = arith.constant 3 : i32
    %8 = arith.addi %c0_i32, %c3_i32 : i32
    %c1_i32 = arith.constant 1 : i32
    %9 = scf.for %arg6 = %c0_i32 to %8 step %c1_i32 iter_args(%arg7 = %7) -> (vector<16x256xf32>)  : i32 {
      %11 = arith.truncf %arg7 : vector<16x256xf32> to vector<16x256xbf16>
      %c0_7 = arith.constant 0 : index
      %c0_8 = arith.constant 0 : index
      %12 = vector.load %arg2[%c0_7, %c0_8] : memref<256x256xbf16, #tpu.memory_space<vmem>>, vector<256x256xbf16>
      %cst_9 = arith.constant dense<0.000000e+00> : vector<16x256xf32>
      %13 = tpu.matmul %11, %12, %cst_9 {dimension_numbers = #tpu.dot_dimension_numbers<[1], [0], [0], [1], [0, 0, 1, 1], [], []>} : vector<16x256xbf16>, vector<256x256xbf16>, vector<16x256xf32> -> vector<16x256xf32>
      %14 = vector.broadcast %0 : vector<1x256xf32> to vector<16x256xf32>
      %15 = arith.addf %13, %14 : vector<16x256xf32>
      %cst_10 = arith.constant 0.000000e+00 : f32
      %16 = vector.broadcast %cst_10 : f32 to vector<16x256xf32>
      %17 = arith.maximumf %15, %16 : vector<16x256xf32>
      %18 = arith.select %5, %17, %15 : vector<16x256xi1>, vector<16x256xf32>
      scf.yield %18 : vector<16x256xf32>
    }
    %c0_5 = arith.constant 0 : index
    %c0_6 = arith.constant 0 : index
    %10 = vector.load %arg5[%c0_5, %c0_6] : memref<16x256xf32, #tpu.memory_space<vmem>>, vector<16x256xf32>
    tpu.vector_store %arg5[%c0_5, %c0_6], %9 {strides = array<i32>} : memref<16x256xf32, #tpu.memory_space<vmem>>, vector<16x256xf32>,
    return
  }
  func.func @transform_0(%arg0: i32) -> (i32, i32) {
    %c0_i32 = arith.constant 0 : i32
    %c0_i32_0 = arith.constant 0 : i32
    return %arg0, %c0_i32 : i32, i32
  }
  func.func @transform_1(%arg0: i32) -> (i32, i32) {
    %c0_i32 = arith.constant 0 : i32
    %c0_i32_0 = arith.constant 0 : i32
    %c0_i32_1 = arith.constant 0 : i32
    return %c0_i32, %c0_i32_0 : i32, i32
  }
  func.func @transform_2(%arg0: i32) -> (i32, i32) {
    %c0_i32 = arith.constant 0 : i32
    %c0_i32_0 = arith.constant 0 : i32
    %c0_i32_1 = arith.constant 0 : i32
    return %c0_i32, %c0_i32_0 : i32, i32
  }
  func.func @transform_3(%arg0: i32) -> (i32, i32) {
    %c0_i32 = arith.constant 0 : i32
    %c0_i32_0 = arith.constant 0 : i32
    %c0_i32_1 = arith.constant 0 : i32
    return %c0_i32, %c0_i32_0 : i32, i32
  }
  func.func @transform_4(%arg0: i32) -> (i32, i32) {
    %c0_i32 = arith.constant 0 : i32
    %c0_i32_0 = arith.constant 0 : i32
    return %arg0, %c0_i32 : i32, i32
  }
}

</mosaic_0001>

<bundles_post_ra>
// kernel: a_call__.1
= control target key start
LH: loop header
LB: loop body
LE: loop exit
PB: predicated region body
PF: predicated region fallthrough
CT: control target
= control target key end

     0   :  { %9 = vsyncpa [#allocation3], 0  ;;  %s769_s0 = inlined_call_operand.vmem [shape: bf16[16,256], index: 0, kind: input, shape index: {}]   ;;  %s770_s1 = inlined_call_operand.hbm [shape: bf16[256,256], index: 1, kind: input, shape index: {}]   ;;  %s771_s2 = inlined_call_operand.vmem [shape: f32[1,256], index: 2, kind: input, shape index: {}]   ;;  %s772_s3 = inlined_call_operand.vmem [shape: f32[1,256], index: 3, kind: input, shape index: {}]   ;;  %s773_s4 = inlined_call_operand.hbm [shape: f32[16,256], index: 4, kind: output, shape index: {}]  }
   0x1   :  { %10 = vsyncpa [#allocation4], 0  ;;  %s17_s17 = sshll.u32 %s770_s1, 4  ;;  %s660_s18 = smov [#allocation2]   ;;  %s18_s17 = int_to_ptr.hbm [resolvable:$true] %s17_s17 }
   0x2   :  { %s19_s19 = sshll.u32 %s660_s18, 4  ;;  %s661_s20 = smov 128   ;;  %s20_s19 = int_to_ptr.vmem [resolvable:$true] %s19_s19 }
   0x3   :  { %s662_s21 = smov 8  }
   0x4   :  { %25 = dma.hbm_to_vmem [thread:$0]  %s18_s17, 4096, %s20_s19, [#allocation3], %s661_s20, %s661_s20, %s662_s21  }
   0x5   :  { %636 = dma.done.wait [#allocation3], 4096  }
   0x6   :  { %637 = vsyncadd [#allocation3], 4294963200  ;;  %v697_v0 = vld [vmem:[%s771_s2] sm:$0x3]  ;;  %v44_v5 = vld [vmem:[%s769_s0 + $0x8] sm:$0xff] }
   0x7   :  { %v35_v1 = vld [vmem:[%s772_s3] sm:$0x3]  ;;  %v47_v8 = vunpack.c.l.bf16 %v44_v5   ;;  %v48_v9 = vunpack.c.h.bf16 %v44_v5  }
   0x8   :  { %v43_v2 = vld [vmem:[%s769_s0] sm:$0xff]  ;;  %v37_v3 = vperm.slane %v35_v1, 0  ;;  %v38_v4 = vperm.slane %v35_v1, 1  ;;  %s724_s0 = smov 0  }
   0x9   :  { %v45_v6 = vunpack.c.l.bf16 %v43_v2   ;;  %v46_v7 = vunpack.c.h.bf16 %v43_v2  }
   0xa   :  { %vm708_vm0 = vcmp.gt.f32.partialorder %v37_v3, 0.0  ;;  %vm712_vm1 = vcmp.gt.f32.partialorder %v38_v4, 0.0 }
   0xb LB: > { %v420_v12 = vld [vmem:[#allocation2 + $0x70] sm:$0xf]  ;;  %v505_v13 = vld [vmem:[#allocation2 + $0x74] sm:$0xf0]  ;;  %v504_v17 = vld [vmem:[#allocation2 + $0x74] sm:$0xf]  ;;  %s658_s0 = sphi %s724_s0, %s54_s0   ;;  %v654_v6 = vphi %v45_v6, %v781_v6   ;;  %v650_v7 = vphi %v46_v7, %v780_v7   ;;  %v646_v8 = vphi %v47_v8, %v779_v8   ;;  %v642_v9 = vphi %v48_v9, %v778_v9  }
   0xc   : > { %v484_v14 = vld [vmem:[#allocation2 + $0xf0] sm:$0xf]  ;;  %v421_v15 = vor.u32 %v505_v13, %v420_v12  ;;  %v521_v16 = vld [vmem:[#allocation2 + $0xf4] sm:$0xf0]  ;;  %v422_v18 = vld [vmem:[#allocation2 + $0x78] sm:$0xf0] }
   0xd   : > { %v485_v19 = vor.u32 %v521_v16, %v484_v14  ;;  %v425_v20 = vor.u32 %v504_v17, %v422_v18  ;;  %v520_v21 = vld [vmem:[#allocation2 + $0xf4] sm:$0xf]  ;;  %v486_v22 = vld [vmem:[#allocation2 + $0xf8] sm:$0xf0]  ;;  %v412_v23 = vld [vmem:[#allocation2 + $0x60] sm:$0xf] }
   0xe   : > { %258 = vmatpush.bf16.msra.mxu0 %v421_v15  ;;  %v489_v24 = vor.u32 %v520_v21, %v486_v22  ;;  %v503_v25 = vld [vmem:[#allocation2 + $0x64] sm:$0xf0]  ;;  %v476_v26 = vld [vmem:[#allocation2 + $0xe0] sm:$0xf]  ;;  %v502_v30 = vld [vmem:[#allocation2 + $0x64] sm:$0xf] }
   0xf   : > { %v519_v27 = vld [vmem:[#allocation2 + $0xe4] sm:$0xf0]  ;;  %272 = vmatpush.bf16.msra.mxu1 %v485_v19  ;;  %286 = vmatpush.bf16.msra.mxu2 %v425_v20  ;;  %v413_v28 = vor.u32 %v503_v25, %v412_v23  ;;  %v414_v31 = vld [vmem:[#allocation2 + $0x68] sm:$0xf0]  ;;  %v518_v32 = vld [vmem:[#allocation2 + $0xe4] sm:$0xf] }
  0x10   : > { %v477_v29 = vor.u32 %v519_v27, %v476_v26  ;;  %300 = vmatpush.bf16.msra.mxu3 %v489_v24  ;;  %v417_v33 = vor.u32 %v502_v30, %v414_v31  ;;  %v478_v34 = vld [vmem:[#allocation2 + $0xe8] sm:$0xf0]  ;;  %v404_v35 = vld [vmem:[#allocation2 + $0x50] sm:$0xf]  ;;  %v501_v36 = vld [vmem:[#allocation2 + $0x54] sm:$0xf0] }
  0x11   : > { %v481_v37 = vor.u32 %v518_v32, %v478_v34  ;;  %v468_v38 = vld [vmem:[#allocation2 + $0xd0] sm:$0xf]  ;;  %v517_v39 = vld [vmem:[#allocation2 + $0xd4] sm:$0xf0]  ;;  %v500_v40 = vld [vmem:[#allocation2 + $0x54] sm:$0xf]  ;;  %v405_v41 = vor.u32 %v501_v36, %v404_v35 }
  0x12   : > { %259 = vmatpush.bf16.msra.mxu0 %v413_v28  ;;  %v406_v42 = vld [vmem:[#allocation2 + $0x58] sm:$0xf0]  ;;  %v516_v43 = vld [vmem:[#allocation2 + $0xd4] sm:$0xf]  ;;  %v469_v45 = vor.u32 %v517_v39, %v468_v38  ;;  %v396_v47 = vld [vmem:[#allocation2 + $0x40] sm:$0xf] }
  0x13   : > { %v470_v44 = vld [vmem:[#allocation2 + $0xd8] sm:$0xf0]  ;;  %273 = vmatpush.bf16.msra.mxu1 %v477_v29  ;;  %287 = vmatpush.bf16.msra.mxu2 %v417_v33  ;;  %v409_v46 = vor.u32 %v500_v40, %v406_v42  ;;  %v499_v48 = vld [vmem:[#allocation2 + $0x44] sm:$0xf0]  ;;  %v460_v49 = vld [vmem:[#allocation2 + $0xc0] sm:$0xf] }
  0x14   : > { %301 = vmatpush.bf16.msra.mxu3 %v481_v37  ;;  %v473_v50 = vor.u32 %v516_v43, %v470_v44  ;;  %v515_v51 = vld [vmem:[#allocation2 + $0xc4] sm:$0xf0]  ;;  %v498_v52 = vld [vmem:[#allocation2 + $0x44] sm:$0xf]  ;;  %v398_v53 = vld [vmem:[#allocation2 + $0x48] sm:$0xf0]  ;;  %v397_v56 = vor.u32 %v499_v48, %v396_v47 }
  0x15   : > { %v514_v54 = vld [vmem:[#allocation2 + $0xc4] sm:$0xf]  ;;  %v462_v55 = vld [vmem:[#allocation2 + $0xc8] sm:$0xf0]  ;;  %v461_v57 = vor.u32 %v515_v51, %v460_v49  ;;  %v401_v58 = vor.u32 %v498_v52, %v398_v53  ;;  %v388_v59 = vld [vmem:[#allocation2 + $0x30] sm:$0xf]  ;;  %v59_v51 = vpack.c.bf16 %v646_v8, %v654_v6  ;;  %v60_v52 = vpack.c.bf16 %v642_v9, %v650_v7 }
  0x16   : > { %260 = vmatpush.bf16.msra.mxu0 %v405_v41  ;;  %v497_v60 = vld [vmem:[#allocation2 + $0x34] sm:$0xf0]  ;;  %v452_v61 = vld [vmem:[#allocation2 + $0xb0] sm:$0xf]  ;;  %v465_v62 = vor.u32 %v514_v54, %v462_v55  ;;  %v496_v1 = vld [vmem:[#allocation2 + $0x34] sm:$0xf] }
  0x17   : > { %274 = vmatpush.bf16.msra.mxu1 %v469_v45  ;;  %288 = vmatpush.bf16.msra.mxu2 %v409_v46  ;;  %v513_v63 = vld [vmem:[#allocation2 + $0xb4] sm:$0xf0]  ;;  %v390_v2 = vld [vmem:[#allocation2 + $0x38] sm:$0xf0]  ;;  %v512_v3 = vld [vmem:[#allocation2 + $0xb4] sm:$0xf]  ;;  %v389_v5 = vor.u32 %v497_v60, %v388_v59 }
  0x18   : > { %302 = vmatpush.bf16.msra.mxu3 %v473_v50  ;;  %v454_v4 = vld [vmem:[#allocation2 + $0xb8] sm:$0xf0]  ;;  %v453_v12 = vor.u32 %v513_v63, %v452_v61  ;;  %v393_v13 = vor.u32 %v496_v1, %v390_v2  ;;  %v380_v14 = vld [vmem:[#allocation2 + $0x20] sm:$0xf]  ;;  %v495_v15 = vld [vmem:[#allocation2 + $0x24] sm:$0xf0] }
  0x19   : > { %v444_v16 = vld [vmem:[#allocation2 + $0xa0] sm:$0xf]  ;;  %v457_v17 = vor.u32 %v512_v3, %v454_v4  ;;  %v511_v18 = vld [vmem:[#allocation2 + $0xa4] sm:$0xf0]  ;;  %v494_v19 = vld [vmem:[#allocation2 + $0x24] sm:$0xf]  ;;  %v381_v23 = vor.u32 %v495_v15, %v380_v14 }
  0x1a   : > { %261 = vmatpush.bf16.msra.mxu0 %v397_v56  ;;  %v382_v20 = vld [vmem:[#allocation2 + $0x28] sm:$0xf0]  ;;  %v510_v21 = vld [vmem:[#allocation2 + $0xa4] sm:$0xf]  ;;  %v445_v24 = vor.u32 %v511_v18, %v444_v16  ;;  %v372_v26 = vld [vmem:[#allocation2 + $0x10] sm:$0xf] }
  0x1b   : > { %275 = vmatpush.bf16.msra.mxu1 %v461_v57  ;;  %289 = vmatpush.bf16.msra.mxu2 %v401_v58  ;;  %v446_v22 = vld [vmem:[#allocation2 + $0xa8] sm:$0xf0]  ;;  %v385_v25 = vor.u32 %v494_v19, %v382_v20  ;;  %v493_v27 = vld [vmem:[#allocation2 + $0x14] sm:$0xf0]  ;;  %v436_v28 = vld [vmem:[#allocation2 + $0x90] sm:$0xf] }
  0x1c   : > { %303 = vmatpush.bf16.msra.mxu3 %v465_v62  ;;  %v449_v29 = vor.u32 %v510_v21, %v446_v22  ;;  %v509_v30 = vld [vmem:[#allocation2 + $0x94] sm:$0xf0]  ;;  %v492_v31 = vld [vmem:[#allocation2 + $0x14] sm:$0xf]  ;;  %v374_v32 = vld [vmem:[#allocation2 + $0x18] sm:$0xf0]  ;;  %v373_v35 = vor.u32 %v493_v27, %v372_v26 }
  0x1d   : > { %v508_v33 = vld [vmem:[#allocation2 + $0x94] sm:$0xf]  ;;  %v438_v34 = vld [vmem:[#allocation2 + $0x98] sm:$0xf0]  ;;  %v437_v36 = vor.u32 %v509_v30, %v436_v28  ;;  %v377_v37 = vor.u32 %v492_v31, %v374_v32  ;;  %v364_v38 = vld [vmem:[#allocation2] sm:$0xf] }
  0x1e   : > { %262 = vmatpush.bf16.msra.mxu0 %v389_v5  ;;  %v491_v39 = vld [vmem:[#allocation2 + $0x4] sm:$0xf0]  ;;  %v428_v40 = vld [vmem:[#allocation2 + $0x80] sm:$0xf]  ;;  %v441_v41 = vor.u32 %v508_v33, %v438_v34  ;;  %v490_v43 = vld [vmem:[#allocation2 + $0x4] sm:$0xf] }
  0x1f   : > { %276 = vmatpush.bf16.msra.mxu1 %v453_v12  ;;  %290 = vmatpush.bf16.msra.mxu2 %v393_v13  ;;  %v507_v42 = vld [vmem:[#allocation2 + $0x84] sm:$0xf0]  ;;  %v366_v44 = vld [vmem:[#allocation2 + $0x8] sm:$0xf0]  ;;  %v506_v45 = vld [vmem:[#allocation2 + $0x84] sm:$0xf]  ;;  %v365_v47 = vor.u32 %v491_v39, %v364_v38 }
  0x20   : > { %304 = vmatpush.bf16.msra.mxu3 %v457_v17  ;;  %v430_v46 = vld [vmem:[#allocation2 + $0x88] sm:$0xf0]  ;;  %v429_v48 = vor.u32 %v507_v42, %v428_v40  ;;  %v369_v49 = vor.u32 %v490_v43, %v366_v44  ;;  %v94_v53 = vperm.slane %v697_v0, 0  ;;  %v95_v58 = vperm.slane %v697_v0, 1  ;;  %s54_s0 = sadd.s32 1, %s658_s0  }
  0x21   : > { %v433_v50 = vor.u32 %v506_v45, %v430_v46  ;;  %p51_p0 = scmp.ge.s32.totalorder %s54_s0, 3  }
  0x22   : > { %263 = vmatpush.bf16.msra.mxu0 %v381_v23  ;;  %s332_s29 = sshll.u32 (%p51_p0), %s773_s4, 4  ;;  %s663_s30 = smov (%p51_p0), [#allocation5]   ;;  %s333_s29 = int_to_ptr.hbm [resolvable:$true] %s332_s29 }
  0x23   : > { %277 = vmatpush.bf16.msra.mxu1 %v445_v24  ;;  %291 = vmatpush.bf16.msra.mxu2 %v385_v25  ;;  %s330_s5 = sshll.u32 (%p51_p0), %s663_s30, 4  ;;  %s664_s6 = smov (%p51_p0), 256   ;;  %s331_s5 = int_to_ptr.vmem [resolvable:$true] %s330_s5 }
  0x24   : > { %305 = vmatpush.bf16.msra.mxu3 %v449_v29  ;;  %s665_s7 = smov (%p51_p0), 16  }
  0x26   : > { %264 = vmatpush.bf16.msra.mxu0 %v373_v35 }
  0x27   : > { %278 = vmatpush.bf16.msra.mxu1 %v437_v36  ;;  %292 = vmatpush.bf16.msra.mxu2 %v377_v37 }
  0x28   : > { %306 = vmatpush.bf16.msra.mxu3 %v441_v41 }
  0x2a   : > { %265 = vmatpush.bf16.msra.mxu0 %v365_v47 }
  0x2b   : > { %279 = vmatpush.bf16.msra.mxu1 %v429_v48  ;;  %293 = vmatpush.bf16.msra.mxu2 %v369_v49 }
  0x2c   : > { %307 = vmatpush.bf16.msra.mxu3 %v433_v50 }
  0x2d   : > { %266 = vmatmul.bf16.vlgmr.msra.gmra.mxu0 %v59_v51 }
  0x2e   : > { %280 = vmatmul.bf16.vlgmr.msra.gmra.mxu1 %v60_v52  ;;  %294 = vmatmul.bf16.vlgmr.msra.gmra.mxu2 %v59_v51 }
  0x2f   : > { %308 = vmatmul.bf16.vlgmr.msra.gmra.mxu3 %v60_v52 }
  0xaa   : > { %v267_v54 = vpop.f32.mrf.mxu0 }
  0xab   : > { %v268_v55 = vadd.f32 %v267_v54, %v94_v53  ;;  %v281_v56 = vpop.f32.mrf.mxu1 }
  0xad   : > { %v282_v57 = vadd.f32 %v281_v56, %v268_v55 }
  0xaf   : > { %v314_v6 = vmax.f32 %v282_v57, 0.0 }
  0xb1   : > { %v318_v59 = vsel %vm708_vm0, %v314_v6, %v282_v57   ;;  %v295_v7 = vpop.f32.mrf.mxu2 }
  0xb2   : > { %v296_v8 = vadd.f32 %v295_v7, %v95_v58  ;;  %v309_v9 = vpop.f32.mrf.mxu3  ;;  %v269_v60 = vpop.f32.mrf.mxu0  ;;  %v781_v6 = vmov %v318_v59  ;;  %322 = vst [vmem:[#allocation5] sm:$0xff] (%p51_p0), %v318_v59 }
  0xb3   : > { %v270_v61 = vadd.f32 %v269_v60, %v94_v53  ;;  %v283_v63 = vpop.f32.mrf.mxu1 }
  0xb4   : > { %v310_v62 = vadd.f32 %v309_v9, %v296_v8 }
  0xb5   : > { %v284_v1 = vadd.f32 %v283_v63, %v270_v61 }
  0xb6   : > { %v315_v2 = vmax.f32 %v310_v62, 0.0 }
  0xb7   : > { %v316_v3 = vmax.f32 %v284_v1, 0.0 }
  0xb8   : > { %v319_v4 = vsel %vm712_vm1, %v315_v2, %v310_v62  }
  0xb9   : > { %v320_v5 = vsel %vm708_vm0, %v316_v3, %v284_v1   ;;  %v297_v12 = vpop.f32.mrf.mxu2  ;;  %v780_v7 = vmov %v319_v4  ;;  %323 = vst [vmem:[#allocation5 + $0x8] sm:$0xff] (%p51_p0), %v319_v4 }
  0xba   : > { %v298_v13 = vadd.f32 %v297_v12, %v95_v58  ;;  %v311_v14 = vpop.f32.mrf.mxu3  ;;  %v779_v8 = vmov %v320_v5  ;;  %324 = vst [vmem:[#allocation5 + $0x10] sm:$0xff] (%p51_p0), %v320_v5 }
  0xbc   : > { %v312_v15 = vadd.f32 %v311_v14, %v298_v13 }
  0xbd   :  { %53 = sbr.rel (!%p51_p0) target bundleno = 11 (0xb), region = 47 }
  0xbe   : > { %v317_v16 = vmax.f32 %v312_v15, 0.0 }
  0xc0   : > { %v321_v17 = vsel %vm712_vm1, %v317_v16, %v312_v15  }
  0xc1   : > { %v778_v9 = vmov %v321_v17  ;;  %325 = vst [vmem:[#allocation5 + $0x18] sm:$0xff] (%p51_p0), %v321_v17 }
  0xc2   :  { %338 = dma.vmem_to_hbm [thread:$0]  %s331_s5, 512, %s333_s29, [#allocation4], %s664_s6, %s664_s6, %s665_s7  }
  0xc3   :  { %638 = dma.done.wait [#allocation4], 512  }
  0xc4   :  { %639 = vsyncadd [#allocation4], 4294966784 }
  0xc5   :  { %343 = vsyncpa [#allocation3], 1 }
  0xc6   :  { %344 = vsyncpa [#allocation4], 1 }

</bundles_post_ra>
